<compile_context>
chip_gen: v6e
topology: v6e:2x2x1
jax: 0.10.0
libtpu: 0.0.40
codegen_flags: <defaults>
</compile_context>

<pallas_src>
import functools

import jax
import jax.numpy as jnp
from jax.experimental import pallas as pl
from jax.experimental.pallas import tpu as pltpu


def _round_up(x, m):
    return ((x + m - 1) // m) * m


# ---------------------------------------------------------------------------
# Fused Pallas kernel: grid = (batch_tiles, num_layers).
#   x_ref : [tm, Dpad]   f32   input activations (read only at layer 0)
#   w_ref : [Dpad, Dpad] bf16  this layer's padded weight (x @ W layout)
#   b_ref : [1, Dpad]    f32   this layer's padded bias
#   o_ref : [tm, Dpad]   f32   final output (written only at the last layer)
#   h_ref : [tm, Dpad]   f32   VMEM scratch: running activation across layers
# ---------------------------------------------------------------------------
def _ff_encoder_kernel(x_ref, w_ref, b_ref, o_ref, h_ref, *, activation):
    layer = pl.program_id(1)

    @pl.when(layer == 0)
    def _():
        h_ref[...] = x_ref[...]

    # bf16 MXU inputs, f32 accumulation; bias + activation epilogue in f32 (VPU/EUP).
    y = jnp.dot(h_ref[...].astype(jnp.bfloat16), w_ref[...],
                preferred_element_type=jnp.float32) + b_ref[...]

    if activation == "relu":
        y = jnp.maximum(y, 0.0)
    elif activation == "tanh":
        y = jnp.tanh(y)
    elif activation == "sigmoid":
        y = jax.nn.sigmoid(y)
    elif activation == "none":
        pass
    else:
        raise ValueError("Invalid activation function")

    h_ref[...] = y

    @pl.when(layer == pl.num_programs(1) - 1)
    def _():
        o_ref[...] = y.astype(o_ref.dtype)


@functools.partial(jax.jit, static_argnames=("activation", "out_dim"))
def ff_encoder_forward(x, w_stacked, b_stacked, *, activation, out_dim):
    """Fused forward: act(...act(act(x @ W0 + b0) @ W1 + b1)...), one pallas_call."""
    B, Din = x.shape
    L, Dpad, _ = w_stacked.shape

    # Pad the batch to a sublane-friendly size; tile it so large batches shard across
    # TensorCores (v7x megacore) via the "parallel" grid axis.
    Bpad = _round_up(max(B, 1), 8)
    if Bpad > 256:
        Bpad = _round_up(Bpad, 256)
        tm = 256
    else:
        tm = Bpad

    xp = jnp.zeros((Bpad, Dpad), jnp.float32).at[:B, :Din].set(x.astype(jnp.float32))

    flops = 2 * Bpad * Dpad * Dpad * L
    transcendentals = Bpad * Dpad * L if activation in ("tanh", "sigmoid") else 0
    bytes_accessed = (Bpad * Dpad * 4            # x (f32)
                      + L * Dpad * Dpad * 2      # weights (bf16)
                      + L * Dpad * 4             # biases (f32)
                      + Bpad * Dpad * 4)         # output (f32)

    kernel = functools.partial(_ff_encoder_kernel, activation=activation)

    out_pad = pl.pallas_call(
        kernel,
        out_shape=jax.ShapeDtypeStruct((Bpad, Dpad), jnp.float32),
        grid=(Bpad // tm, L),
        in_specs=[
            pl.BlockSpec((tm, Dpad), lambda i, l: (i, 0)),
            pl.BlockSpec((None, Dpad, Dpad), lambda i, l: (l, 0, 0)),
            pl.BlockSpec((None, 1, Dpad), lambda i, l: (l, 0, 0)),
        ],
        out_specs=pl.BlockSpec((tm, Dpad), lambda i, l: (i, 0)),
        scratch_shapes=[pltpu.VMEM((tm, Dpad), jnp.float32)],
        compiler_params=pltpu.CompilerParams(
            dimension_semantics=("parallel", "arbitrary"),
        ),
        cost_estimate=pl.CostEstimate(
            flops=flops,
            transcendentals=transcendentals,
            bytes_accessed=bytes_accessed,
        ),
    )(xp, w_stacked, b_stacked)

    return out_pad[:B, :out_dim]


# ---------------------------------------------------------------------------
# ffEncoder: parameter construction + forward pass (all layers fused in-kernel).
# ---------------------------------------------------------------------------
class FFEncoder:
    def __init__(self, obs_dim, hidden_dims, activation="relu", key=None):
        assert activation in ("relu", "tanh", "sigmoid", "none"), "Invalid activation function"
        self.activation = activation
        self.out_dim = int(hidden_dims[-1])
        if key is None:
            key = jax.random.PRNGKey(0)

        dims = [int(obs_dim)] + [int(h) for h in hidden_dims]
        self.params = []
        for i in range(len(hidden_dims)):
            fan_in, fan_out = dims[i], dims[i + 1]
            key, kw, kb = jax.random.split(key, 3)
            # Mirror nn.Linear default init: U(-1/sqrt(fan_in), 1/sqrt(fan_in)).
            bound = 1.0 / float(fan_in ** 0.5)
            w = jax.random.uniform(kw, (fan_in, fan_out), jnp.float32, -bound, bound)
            b = jax.random.uniform(kb, (fan_out,), jnp.float32, -bound, bound)
            self.params.append((w, b))

        # Zero-pad every layer to a common lane-dense width (multiple of 128) and
        # stack so the fused kernel streams one layer's weights per grid step.
        Dpad = _round_up(max(dims), 128)
        ws, bs = [], []
        for w, b in self.params:
            wp = jnp.zeros((Dpad, Dpad), jnp.float32).at[: w.shape[0], : w.shape[1]].set(w)
            bp = jnp.zeros((1, Dpad), jnp.float32).at[0, : b.shape[0]].set(b)
            ws.append(wp)
            bs.append(bp)
        self.w_stacked = jnp.stack(ws).astype(jnp.bfloat16)   # [L, Dpad, Dpad]
        self.b_stacked = jnp.stack(bs)                         # [L, 1, Dpad]
        self.Dpad = Dpad

    def __call__(self, x):
        # T(x, device) in the reference just converts the input to a tensor.
        x = jnp.asarray(x, dtype=jnp.float32)
        return ff_encoder_forward(x, self.w_stacked, self.b_stacked,
                                  activation=self.activation, out_dim=self.out_dim)


# Pure-JAX f32 reference for the correctness check.
def ff_encoder_ref(x, params, activation="relu"):
    acts = {
        "relu": lambda v: jnp.maximum(v, 0.0),
        "tanh": jnp.tanh,
        "sigmoid": jax.nn.sigmoid,
        "none": lambda v: v,
    }
    f = acts[activation]
    for w, b in params:
        x = f(x @ w + b)
    return x


if __name__ == "__main__":
    key = jax.random.PRNGKey(0)
    batch, obs_dim = 8, 16
    hidden_dims = [32, 32]

    kx, kp1, kp2 = jax.random.split(key, 3)
    x = jax.random.normal(kx, (batch, obs_dim), jnp.float32)

    for act, kp in (("relu", kp1), ("sigmoid", kp2)):
        enc = FFEncoder(obs_dim, hidden_dims, activation=act, key=kp)
        out = jax.block_until_ready(enc(x))
        ref = ff_encoder_ref(x, enc.params, act)
        assert out.shape == (batch, hidden_dims[-1])
        # bf16 MXU inputs with f32 accumulation -> small deviation vs the pure-f32
        # reference; tolerance loosened accordingly.
        assert jnp.allclose(out, ref, atol=2e-2, rtol=2e-2), f"mismatch vs reference ({act})"

    print("KERNEL_OK")
</pallas_src>

<mosaic_0001>
module attributes {stable_mosaic.version = 11 : i64} {
  func.func @_ff_encoder_kernel(%arg0: i32, %arg1: i32, %arg2: memref<8x128xf32, #tpu.memory_space<vmem>>, %arg3: memref<1x128x128xbf16, #tpu.memory_space<vmem>>, %arg4: memref<1x1x128xf32, #tpu.memory_space<vmem>>, %arg5: memref<8x128xf32, #tpu.memory_space<vmem>>, %arg6: memref<8x128xf32, #tpu.memory_space<vmem>>) attributes {dimension_semantics = [#tpu.dimension_semantics<parallel>, #tpu.dimension_semantics<arbitrary>], iteration_bounds = array<i64: 1, 2>, scalar_prefetch = 0 : i64, scratch_operands = 1 : i64, tpu.core_type = #tpu.core_type<tc>, window_params = [{transform_indices = @transform_0, window_bounds = array<i64: 8, 128>}, {transform_indices = @transform_1, window_bounds = array<i64: 1, 128, 128>}, {transform_indices = @transform_2, window_bounds = array<i64: 1, 1, 128>}, {transform_indices = @transform_3, window_bounds = array<i64: 8, 128>}]} {
    %c0_i32 = arith.constant 0 : i32
    %0 = arith.cmpi eq, %arg1, %c0_i32 : i32
    %1 = arith.extui %0 : i1 to i32
    %c0_i32_0 = arith.constant 0 : i32
    %2 = arith.cmpi ne, %1, %c0_i32_0 : i32
    scf.if %2 {
      %c0_12 = arith.constant 0 : index
      %c0_13 = arith.constant 0 : index
      %18 = vector.load %arg2[%c0_12, %c0_13] : memref<8x128xf32, #tpu.memory_space<vmem>>, vector<8x128xf32>
      %c0_14 = arith.constant 0 : index
      %c0_15 = arith.constant 0 : index
      %19 = vector.load %arg6[%c0_14, %c0_15] : memref<8x128xf32, #tpu.memory_space<vmem>>, vector<8x128xf32>
      tpu.vector_store %arg6[%c0_14, %c0_15], %18 {strides = array<i32>} : memref<8x128xf32, #tpu.memory_space<vmem>>, vector<8x128xf32>,
    } else {
    }
    %c0 = arith.constant 0 : index
    %c0_1 = arith.constant 0 : index
    %3 = vector.load %arg6[%c0, %c0_1] : memref<8x128xf32, #tpu.memory_space<vmem>>, vector<8x128xf32>
    %4 = arith.truncf %3 : vector<8x128xf32> to vector<8x128xbf16>
    %c0_2 = arith.constant 0 : index
    %c0_3 = arith.constant 0 : index
    %c0_4 = arith.constant 0 : index
    %5 = vector.load %arg3[%c0_2, %c0_3, %c0_4] : memref<1x128x128xbf16, #tpu.memory_space<vmem>>, vector<1x128x128xbf16>
    %6 = vector.shape_cast %5 : vector<1x128x128xbf16> to vector<128x128xbf16>
    %cst = arith.constant dense<0.000000e+00> : vector<8x128xf32>
    %7 = tpu.matmul %4, %6, %cst {dimension_numbers = #tpu.dot_dimension_numbers<[1], [0], [0], [1], [0, 0, 1, 1], [], []>} : vector<8x128xbf16>, vector<128x128xbf16>, vector<8x128xf32> -> vector<8x128xf32>
    %c0_5 = arith.constant 0 : index
    %c0_6 = arith.constant 0 : index
    %c0_7 = arith.constant 0 : index
    %8 = vector.load %arg4[%c0_5, %c0_6, %c0_7] : memref<1x1x128xf32, #tpu.memory_space<vmem>>, vector<1x1x128xf32>
    %9 = vector.shape_cast %8 : vector<1x1x128xf32> to vector<1x128xf32>
    %10 = vector.broadcast %9 : vector<1x128xf32> to vector<8x128xf32>
    %11 = arith.addf %7, %10 : vector<8x128xf32>
    %cst_8 = arith.constant 0.000000e+00 : f32
    %12 = vector.broadcast %cst_8 : f32 to vector<8x128xf32>
    %13 = arith.maximumf %11, %12 : vector<8x128xf32>
    %c0_9 = arith.constant 0 : index
    %c0_10 = arith.constant 0 : index
    %14 = vector.load %arg6[%c0_9, %c0_10] : memref<8x128xf32, #tpu.memory_space<vmem>>, vector<8x128xf32>
    tpu.vector_store %arg6[%c0_9, %c0_10], %13 {strides = array<i32>} : memref<8x128xf32, #tpu.memory_space<vmem>>, vector<8x128xf32>,
    %c1_i32 = arith.constant 1 : i32
    %15 = arith.cmpi eq, %arg1, %c1_i32 : i32
    %16 = arith.extui %15 : i1 to i32
    %c0_i32_11 = arith.constant 0 : i32
    %17 = arith.cmpi ne, %16, %c0_i32_11 : i32
    scf.if %17 {
      %c0_12 = arith.constant 0 : index
      %c0_13 = arith.constant 0 : index
      %18 = vector.load %arg5[%c0_12, %c0_13] : memref<8x128xf32, #tpu.memory_space<vmem>>, vector<8x128xf32>
      tpu.vector_store %arg5[%c0_12, %c0_13], %13 {strides = array<i32>} : memref<8x128xf32, #tpu.memory_space<vmem>>, vector<8x128xf32>,
    } else {
    }
    return
  }
  func.func @transform_0(%arg0: i32, %arg1: i32) -> (i32, i32) {
    %c0_i32 = arith.constant 0 : i32
    %c0_i32_0 = arith.constant 0 : i32
    return %arg0, %c0_i32 : i32, i32
  }
  func.func @transform_1(%arg0: i32, %arg1: i32) -> (i32, i32, i32) {
    %c0_i32 = arith.constant 0 : i32
    %c0_i32_0 = arith.constant 0 : i32
    %c0_i32_1 = arith.constant 0 : i32
    return %arg1, %c0_i32, %c0_i32_0 : i32, i32, i32
  }
  func.func @transform_2(%arg0: i32, %arg1: i32) -> (i32, i32, i32) {
    %c0_i32 = arith.constant 0 : i32
    %c0_i32_0 = arith.constant 0 : i32
    %c0_i32_1 = arith.constant 0 : i32
    return %arg1, %c0_i32, %c0_i32_0 : i32, i32, i32
  }
  func.func @transform_3(%arg0: i32, %arg1: i32) -> (i32, i32) {
    %c0_i32 = arith.constant 0 : i32
    %c0_i32_0 = arith.constant 0 : i32
    return %arg0, %c0_i32 : i32, i32
  }
}

</mosaic_0001>

<bundles_post_ra>
// kernel: ff_encoder_forward.1
= control target key start
LH: loop header
LB: loop body
LE: loop exit
PB: predicated region body
PF: predicated region fallthrough
CT: control target
= control target key end

     0   :  { %8 = vsyncpa [#allocation4], 0  ;;  %s846_s0 = inlined_call_operand.vmem [shape: f32[8,128], index: 0, kind: input, shape index: {}]   ;;  %s847_s1 = inlined_call_operand.hbm [shape: bf16[2,128,128], index: 1, kind: input, shape index: {}]   ;;  %s848_s2 = inlined_call_operand.vmem [shape: f32[2,1,128], index: 2, kind: input, shape index: {}]   ;;  %s849_s3 = inlined_call_operand.hbm [shape: f32[8,128], index: 3, kind: output, shape index: {}]  }
   0x1   :  { %10 = vsyncpa [#allocation4 + $0x1], 0 }
   0x2   :  { %11 = vsyncpa [#allocation5], 0  ;;  %s708_s12 = smov 0   ;;  %s710_s13 = smov 0  }
   0x3   :  { %s712_s14 = smov 0   ;;  %s714_s15 = smov 0  }
   0x4   :  { %s716_s16 = smov 0   ;;  %s718_s17 = smov 0  }
   0x5 LB: > { %s446_s18 = sadd.s32 4294967295, %s680_s17   ;;  %s26_s19 = sadd.s32 1, %s676_s16  ;;  %s680_s17 = sphi %s718_s17, %s17_s17   ;;  %s676_s16 = sphi %s716_s16, %s858_s16   ;;  %s672_s15 = sphi %s714_s15, %s857_s15   ;;  %s668_s14 = sphi %s712_s14, %s856_s14   ;;  %s664_s13 = sphi %s710_s13, %s855_s13   ;;  %s660_s12 = sphi %s708_s12, %s854_s12  }
   0x6   : > { %p27_p0 = scmp.ge.s32.totalorder %s26_s19, 2  ;;  %s62_s20 = sadd.s32 1, %s668_s14 }
   0x7   : > { %p69_p1 = scmp.ne.s32.totalorder %s668_s14, %s664_s13  ;;  %p70_p2 = scmp.eq.s32.totalorder %s680_s17, 0 }
   0x8   : > { %s860_s19 = smov (%p27_p0, %s26_s19), 0  ;;  %p75_p4 = scmp.ne.s32.totalorder %s664_s13, %s660_s12 }
   0x9   : > { %p744_p3 = por %p70_p2, %p69_p1  ;;  %s59_s22 = ssub.s32 %s676_s16, %s860_s19 }
   0xa   : > { %p76_p5 = scmp.eq.s32.totalorder %s446_s18, 0  ;;  %p60_p6 = scmp.eq.s32.totalorder %s59_s22, 0 }
   0xb   : > { %p510_p8 = scmp.lt.s32.totalorder %s680_s17, 2  ;;  %s158_s25 = sand.u32 1, %s668_s14  }
   0xc   : > { %p753_p7 = por %p76_p5, %p75_p4  ;;  %s470_s26 = sshll.u32 %s676_s16, 10 }
   0xd   : > { %s759_s24 = scalar_select %p60_p6, %s668_s14, %s62_s20  }
   0xe   : > { %s450_s27 = sshll.u32 %s158_s25, 6  ;;  %s168_s30 = scalar_lea.hbm %s847_s1, %s470_s26 }
   0xf   : > { %s162_s4 = scalar_lea.vmem [#allocation3], %s450_s27  ;;  %p768_p9 = pnand %p510_p8, %p744_p3 }
  0x10   : > { %s169_s5 = sshll.u32 %s162_s4, 4  ;;  %s159_s7 = scalar_lea.sflag [#allocation4], %s158_s25  ;;  %s170_s5 = int_to_ptr.vmem [resolvable:$true] %s169_s5 }
  0x11   : > { %p576_p10 = pneg %p768_p9  ;;  %s587_s8 = scalar_lea.vmem %s170_s5, 1024 }
  0x12   : > { %p588_p11 = scmp.ne.s32.totalorder %s170_s5, %s587_s8  ;;  %s682_s9 = smov [#allocation3]  }
  0x13   : > { %s592_s10 = sshll.u32 %s682_s9, 4  ;;  %s593_s10 = int_to_ptr.vmem [resolvable:$false] %s592_s10 }
  0x14   : > { %p590_p12 = pnand %p588_p11, %p576_p10  ;;  %s594_s11 = scalar_lea.vmem %s593_s10, 2048 }
  0x15   : > { %p595_p0 = scmp.lt.s32.totalorder %s170_s5, %s593_s10  ;;  %p596_p1 = scmp.lt.s32.totalorder %s594_s11, %s587_s8 }
  0x16   : > { %p591_p13 = pneg %p590_p12 }
  0x17   : > { %p597_p2 = por %p596_p1, %p595_p0 }
  0x19   : > { %p598_p3 = pnand %p597_p2, %p591_p13 }
  0x1b   : > { %601 = shalt.err (!%p598_p3)
}
  0x1c   : > { %s683_s12 = smov 64   ;;  %s684_s20 = smov 4  }
  0x1d   : > { %509 = dma.hbm_to_vmem [thread:$0]  (!%p768_p9), %s168_s30, 1024, %s170_s5, %s159_s7, %s683_s12, %s683_s12, %s684_s20  }
  0x1e   : > { %p453_p4 = scmp.ge.s32.totalorder %s680_s17, 1  ;;  %p183_p5 = scmp.lt.s32.totalorder %s680_s17, 3 }
  0x20   : > { %p184_p6 = pnand %p453_p4, %p183_p5 }
  0x21   : > { %s189_s21 = sand.u32 (!%p184_p6), 1, %s664_s13  }
  0x22   : > { %187 = sbr.rel (%p184_p6) target bundleno = 298 (0x12a), region = 32  ;;  %s454_s22 = sshll.u32 (!%p184_p6), %s189_s21, 6 }
  0x23   : > { %s190_s25 = scalar_lea.sflag (!%p184_p6), [#allocation4], %s189_s21  ;;  %s779_s26 = scalar_lea.vmem (!%p184_p6), [#allocation3], %s454_s22 }
  0x27   : > { %651 = dma.done.wait (%p753_p7), %s190_s25, 1024  }
  0x28   : > { %653 = vsyncadd (%p753_p7), %s190_s25, 4294966272  ;;  %p222_p8 = scmp.lt.s32.totalorder %s672_s15, 1  ;;  %p455_p9 = scmp.ne.s32.totalorder %s672_s15, 0 }
  0x2a   : > { %s787_s27 = scalar_select %p222_p8, %s672_s15, 1 }
  0x2b   : > { %229 = sbr.rel (%p455_p9) target bundleno = 50 (0x32), region = 40 }
  0x2c   : > { %s224_s30 = scalar_lea.vmem %s848_s2, %s787_s27 }
  0x30   : > { %v230_v0 = vld [vmem:[%s846_s0] sm:$0xff] }
  0x31   : > { %231 = vst [vmem:[#allocation2] sm:$0xff] %v230_v0 }
  0x32 PF: > { %v566_v1 = vld [vmem:[%s779_s26 + $0x38] sm:$0xff]   ;;  %v685_v2 = vmov 0.0   ;;  %v567_v3 = vld [vmem:[%s779_s26 + $0x30] sm:$0xff]   ;;  %vm686_vm0 = vmmov 0   ;;  %v568_v4 = vld [vmem:[%s779_s26 + $0x28] sm:$0xff]   ;;  %p465_p7 = scmp.ne.s32.totalorder %s672_s15, 1 }
  0x33   : > { %480 = vmatprep.subr.bf16.mxu0 %v685_v2  ;;  %496 = vmatprep.mubr.msk.bf16.mxu0 %vm686_vm0, %v685_v2  ;;  %v569_v5 = vld [vmem:[%s779_s26 + $0x20] sm:$0xff]   ;;  %v570_v6 = vld [vmem:[%s779_s26 + $0x18] sm:$0xff]   ;;  %v571_v7 = vld [vmem:[%s779_s26 + $0x10] sm:$0xff]  }
  0x34   : > { %481 = vmatpush3.bf16.msra.mxu0 %v566_v1  ;;  %v572_v8 = vld [vmem:[%s779_s26 + $0x8] sm:$0xff]   ;;  %v573_v9 = vld [vmem:[%s779_s26] sm:$0xff]   ;;  %v456_v12 = vld [vmem:[%s224_s30] ss:$0 sm:$0xff] }
  0x35   : > { %482 = vmatprep.subr.bf16.mxu0 %v685_v2 }
  0x38   : > { %483 = vmatpush3.bf16.msra.mxu0 %v567_v3  ;;  %v232_v10 = vld [vmem:[#allocation2] sm:$0xff] }
  0x39   : > { %484 = vmatprep.subr.bf16.mxu0 %v685_v2  ;;  %v233_v11 = vpack.c.bf16 %v232_v10, %v232_v10 }
  0x3c   : > { %485 = vmatpush3.bf16.msra.mxu0 %v568_v4 }
  0x3d   : > { %486 = vmatprep.subr.bf16.mxu0 %v685_v2 }
  0x40   : > { %487 = vmatpush3.bf16.msra.mxu0 %v569_v5 }
  0x41   : > { %488 = vmatprep.subr.bf16.mxu0 %v685_v2 }
  0x44   : > { %489 = vmatpush3.bf16.msra.mxu0 %v570_v6 }
  0x45   : > { %490 = vmatprep.subr.bf16.mxu0 %v685_v2 }
  0x48   : > { %491 = vmatpush3.bf16.msra.mxu0 %v571_v7 }
  0x49   : > { %492 = vmatprep.subr.bf16.mxu0 %v685_v2 }
  0x4c   : > { %493 = vmatpush3.bf16.msra.mxu0 %v572_v8 }
  0x4d   : > { %494 = vmatprep.subr.bf16.mxu0 %v685_v2 }
  0x50   : > { %495 = vmatpush3.bf16.msra.mxu0 %v573_v9 }
  0x53   : > { %497 = vmatmul.mubr.bf16.vlgmr.msra.gmra.mxu0 %v233_v11 }
 0x113   : > { %v339_v13 = vpop.f32.mrf.mxu0 }
 0x114   : > { %v340_v14 = vadd.f32 %v456_v12, %v339_v13 }
 0x115   : > { %v498_v15 = vpop.f32.mrf.mxu0  ;;  %350 = sbr.rel (%p465_p7) target bundleno = 283 (0x11b), region = 44 }
 0x116   : > { %v345_v16 = vmax.f32 %v340_v14, 0.0 }
 0x117   : > { %v342_v17 = vpop.f32.mrf.mxu0 }
 0x118   : > { %346 = vst [vmem:[#allocation2] sm:$0xff] %v345_v16 }
 0x119   : > { %v499_v18 = vpop.f32.mrf.mxu0 }
 0x11a   : > { %351 = vst [vmem:[#allocation6] sm:$0xff] %v345_v16 }
 0x11b PF: > { %p813_p10 = scmp.eq.s32.totalorder %s446_s18, 1  ;;  %s687_s8 = smov [#allocation6]  }
 0x11c   : > { %s361_s9 = sshll.u32 %s687_s8, 4  ;;  %s362_s9 = int_to_ptr.vmem [resolvable:$true] %s361_s9 }
 0x11d   : > { %s602_s10 = scalar_lea.vmem %s362_s9, 128  ;;  %p609_p0 = scmp.lt.s32.totalorder %s362_s9, %s362_s9 }
 0x11e   : > { %p603_p11 = scmp.ne.s32.totalorder %s362_s9, %s602_s10  ;;  %p610_p1 = scmp.lt.s32.totalorder %s602_s10, %s602_s10 }
 0x120   : > { %p604_p12 = pnand %p603_p11, %p813_p10  ;;  %p611_p2 = por %p610_p1, %p609_p0 }
 0x122   : > { %p605_p13 = pneg %p604_p12 }
 0x124   : > { %p612_p3 = pnand %p611_p2, %p605_p13 }
 0x126   : > { %615 = shalt.err (!%p612_p3)
}
 0x127   : > { %503 = dma.vmem_to_hbm [thread:$0]  (%p813_p10), %s362_s9, 128, %s849_s3, [#allocation5]  }
 0x128   : > { %655 = dma.done.wait (%p813_p10), [#allocation5], 128  }
 0x129   : > { %657 = vsyncadd (%p813_p10), [#allocation5], 4294967168 }
 0x12a PF: > { %s17_s17 = sadd.s32 1, %s680_s17   ;;  %s854_s12 = smov %s664_s13 }
 0x12b   : > { %p14_p4 = scmp.ge.s32.totalorder %s17_s17, 4   ;;  %s855_s13 = smov %s668_s14 }
 0x12c   : > { %s856_s14 = smov %s759_s24  ;;  %s857_s15 = smov %s676_s16 }
 0x12d   : > { %s858_s16 = smov %s860_s19  ;;  %16 = sbr.rel (!%p14_p4) target bundleno = 5 (0x5), region = 84 }
 0x132   :  { %374 = vsyncpa [#allocation4], 1 }
 0x133   :  { %376 = vsyncpa [#allocation4 + $0x1], 1 }
 0x134   :  { %377 = vsyncpa [#allocation5], 1 }
 0x135   :  { %379 = vsyncpa [#allocation5 + $0x1], 1 }

</bundles_post_ra>
